<compile_context>
chip_gen: v7x
topology: tpu7x:2x2x1
jax: 0.10.0
libtpu: 0.0.40
codegen_flags: <defaults>
</compile_context>

<pallas_src>
import math

import jax
import jax.numpy as jnp
from jax.experimental import pallas as pl
from jax.experimental.pallas import tpu as pltpu


def _cdiv(a, b):
    return (a + b - 1) // b


def _round_up(n, m):
    return _cdiv(n, m) * m


def _pos_emb_kernel(x_ref, w2pi_ref, sin_ref, cos_ref):
    """One batch tile.

    x_ref   : (bt, 1)   timesteps column
    w2pi_ref: (1, h)    weights * 2*pi (pre-folded in the wrapper)
    sin_ref : (bt, h)   sin(freqs)  -- lane-0 aligned dense store
    cos_ref : (bt, h)   cos(freqs)  -- lane-0 aligned dense store
    """
    freqs = x_ref[...] * w2pi_ref[...]          # (bt, h) broadcast mul (VPU)
    # NOTE: sin/cos lower to range-reduction + polynomial on the VPU (not a single
    # EUP op); at these widths the kernel is launch/store-bound, so no trig tricks.
    sin_ref[...] = jnp.sin(freqs)
    cos_ref[...] = jnp.cos(freqs)


def _choose_batch_tile(b):
    """Row-tile choice.

    b <= 1024 : one full-extent block (grid=(1,)), no padding rules apply.
    b  > 1024 : split into >=2 steps (so both v7x TensorCores get a share), each
                tile a multiple of 8 rows; the ragged last block is masked by
                Pallas, so no explicit pad or output slice is needed.
    """
    if b <= 1024:
        return b
    n_steps = max(2, _cdiv(b, 4096))
    return _round_up(_cdiv(b, n_steps), 8)


def random_or_learned_sinusoidal_pos_emb(x, weights):
    """x: (B,) timesteps; weights: (half_dim,).  Returns (B, 2*half_dim + 1)."""
    b = x.shape[0]
    half_dim = weights.shape[0]

    x2 = x.astype(jnp.float32).reshape(b, 1)
    # Fold 2*pi into the weights at trace time (free; removes a per-row mul).
    w2pi = (weights.astype(jnp.float32) * (2.0 * math.pi)).reshape(1, half_dim)

    bt = _choose_batch_tile(b)
    grid = (_cdiv(b, bt),)

    sin, cos = pl.pallas_call(
        _pos_emb_kernel,
        out_shape=(
            jax.ShapeDtypeStruct((b, half_dim), jnp.float32),
            jax.ShapeDtypeStruct((b, half_dim), jnp.float32),
        ),
        grid_spec=pltpu.PrefetchScalarGridSpec(
            num_scalar_prefetch=0,
            grid=grid,
            in_specs=[
                pl.BlockSpec((bt, 1), lambda i: (i, 0)),          # x column, tiled over batch
                pl.BlockSpec((1, half_dim), lambda i: (0, 0)),    # weights*2pi, resident
            ],
            out_specs=[
                pl.BlockSpec((bt, half_dim), lambda i: (i, 0)),   # sin
                pl.BlockSpec((bt, half_dim), lambda i: (i, 0)),   # cos
            ],
        ),
        compiler_params=pltpu.CompilerParams(
            dimension_semantics=("parallel",)),
    )(x2, w2pi)

    # Prepend the x column outside the kernel (it is already on hand here); this
    # keeps every in-kernel store dense and unmasked instead of writing a
    # (2h+1)-wide row that starts sin at lane offset 1.
    return jnp.concatenate([x2, sin, cos], axis=-1)


def _reference(x, weights):
    """Pure-JAX replica of the PyTorch forward for verification."""
    x2 = x.astype(jnp.float32)[:, None]
    freqs = x2 * weights.astype(jnp.float32)[None, :] * 2.0 * math.pi
    return jnp.concatenate([x2, jnp.sin(freqs), jnp.cos(freqs)], axis=-1)


def _run_case(key, batch, dim):
    half_dim = dim // 2
    k_x, k_w = jax.random.split(key)
    x = jax.random.uniform(k_x, (batch,), dtype=jnp.float32)            # timesteps in [0, 1)
    weights = jax.random.normal(k_w, (half_dim,), dtype=jnp.float32)    # nn.Parameter(randn(half_dim))

    out = jax.block_until_ready(random_or_learned_sinusoidal_pos_emb(x, weights))
    ref = _reference(x, weights)

    assert out.shape == (batch, dim + 1), (out.shape, (batch, dim + 1))
    assert jnp.allclose(out, ref, atol=1e-4, rtol=1e-4), \
        f"mismatch vs JAX reference (batch={batch}, dim={dim})"


if __name__ == "__main__":
    key = jax.random.PRNGKey(0)
    k1, k2 = jax.random.split(key)

    # small canonical case: single full-extent block
    _run_case(k1, batch=2, dim=16)
    # larger case: multi-step grid, batch not a multiple of 8 (masked last block)
    _run_case(k2, batch=1030, dim=32)

    print("KERNEL_OK")
</pallas_src>

<mosaic_0001>
module attributes {stable_mosaic.version = 11 : i64} {
  func.func @_pos_emb_kernel(%arg0: i32, %arg1: memref<2x1xf32, #tpu.memory_space<vmem>>, %arg2: memref<1x8xf32, #tpu.memory_space<vmem>>, %arg3: memref<2x8xf32, #tpu.memory_space<vmem>>, %arg4: memref<2x8xf32, #tpu.memory_space<vmem>>) attributes {dimension_semantics = [#tpu.dimension_semantics<parallel>], iteration_bounds = array<i64: 1>, scalar_prefetch = 0 : i64, scratch_operands = 0 : i64, tpu.core_type = #tpu.core_type<tc>, window_params = [{transform_indices = @transform_0, window_bounds = array<i64: 2, 1>}, {pipeline_mode = #tpu.pipeline_mode<synchronous>, transform_indices = @transform_1, window_bounds = array<i64: 1, 8>}, {transform_indices = @transform_2, window_bounds = array<i64: 2, 8>}, {transform_indices = @transform_3, window_bounds = array<i64: 2, 8>}]} {
    %c0 = arith.constant 0 : index
    %c0_0 = arith.constant 0 : index
    %0 = vector.load %arg1[%c0, %c0_0] : memref<2x1xf32, #tpu.memory_space<vmem>>, vector<2x1xf32>
    %c0_1 = arith.constant 0 : index
    %c0_2 = arith.constant 0 : index
    %1 = vector.load %arg2[%c0_1, %c0_2] : memref<1x8xf32, #tpu.memory_space<vmem>>, vector<1x8xf32>
    %2 = vector.broadcast %0 : vector<2x1xf32> to vector<2x8xf32>
    %3 = vector.broadcast %1 : vector<1x8xf32> to vector<2x8xf32>
    %4 = arith.mulf %2, %3 : vector<2x8xf32>
    %5 = math.sin %4 : vector<2x8xf32>
    %c0_3 = arith.constant 0 : index
    %c0_4 = arith.constant 0 : index
    %6 = vector.load %arg3[%c0_3, %c0_4] : memref<2x8xf32, #tpu.memory_space<vmem>>, vector<2x8xf32>
    tpu.vector_store %arg3[%c0_3, %c0_4], %5 {strides = array<i32>} : memref<2x8xf32, #tpu.memory_space<vmem>>, vector<2x8xf32>,
    %7 = math.cos %4 : vector<2x8xf32>
    %c0_5 = arith.constant 0 : index
    %c0_6 = arith.constant 0 : index
    %8 = vector.load %arg4[%c0_5, %c0_6] : memref<2x8xf32, #tpu.memory_space<vmem>>, vector<2x8xf32>
    tpu.vector_store %arg4[%c0_5, %c0_6], %7 {strides = array<i32>} : memref<2x8xf32, #tpu.memory_space<vmem>>, vector<2x8xf32>,
    return
  }
  func.func @transform_0(%arg0: i32) -> (i32, i32) {
    %c0_i32 = arith.constant 0 : i32
    %c0_i32_0 = arith.constant 0 : i32
    return %arg0, %c0_i32 : i32, i32
  }
  func.func @transform_1(%arg0: i32) -> (i32, i32) {
    %c0_i32 = arith.constant 0 : i32
    %c0_i32_0 = arith.constant 0 : i32
    %c0_i32_1 = arith.constant 0 : i32
    return %c0_i32, %c0_i32_0 : i32, i32
  }
  func.func @transform_2(%arg0: i32) -> (i32, i32) {
    %c0_i32 = arith.constant 0 : i32
    %c0_i32_0 = arith.constant 0 : i32
    return %arg0, %c0_i32 : i32, i32
  }
  func.func @transform_3(%arg0: i32) -> (i32, i32) {
    %c0_i32 = arith.constant 0 : i32
    %c0_i32_0 = arith.constant 0 : i32
    return %arg0, %c0_i32 : i32, i32
  }
}

</mosaic_0001>

<bundles_post_ra>
// kernel: tpu_custom_call.1
= control target key start
LH: loop header
LB: loop body
LE: loop exit
PB: predicated region body
PF: predicated region fallthrough
CT: control target
= control target key end

     0   :  { %9 = vsyncpa [#allocation3], 0  ;;  %v342_v1 = vmov 0   ;;  %s424_s0 = inlined_call_operand.vmem [shape: f32[2,1], index: 0, kind: input, shape index: {}]   ;;  %s425_s1 = inlined_call_operand.vmem [shape: f32[1,8], index: 1, kind: input, shape index: {}]   ;;  %s426_s2 = inlined_call_operand.hbm [shape: f32[2,8], index: 2, kind: output, shape index: {0}]   ;;  %s427_s3 = inlined_call_operand.hbm [shape: f32[2,8], index: 3, kind: output, shape index: {1}]  }
   0x1   :  { %v15_v0 = vld [vmem:[%s424_s0] sm:$0x3]  ;;  %289 = vset.pattern.permute.xlu0 %v342_v1 }
   0x2   :  { %19 = vperm.xlu0 %289, %v15_v0  }
   0x3   :  { %10 = vsyncpa [#allocation5], 0  ;;  %v267_v2 = vld [vmem:[%s425_s1] ss:$0 sm:$0xff]  ;;  %v343_v15 = vmov 683565275  }
   0x4   :  { %v344_v17 = vmov 2475754826   ;;  %v345_v20 = vmov 2131351028   ;;  %v346_v23 = vmov 2102212464  }
   0x5   :  { %v347_v26 = vmov 920167782   ;;  %v348_v29 = vmov 1326507024   ;;  %vm133_vm10 = vcmask 58368   ;;  %s349_s0 = smov [#allocation2]  }
   0x6   :  { %s245_s1 = sshll.u32 %s349_s0, 4  ;;  %s350_s16 = smov [#allocation4]   ;;  %s246_s1 = int_to_ptr.vmem [resolvable:$true] %s245_s1 }
   0x7   :  { %s255_s17 = sshll.u32 %s350_s16, 4  ;;  %s294_s18 = scalar_lea.vmem %s246_s1, 32  ;;  %s256_s17 = int_to_ptr.vmem [resolvable:$true] %s255_s17 }
   0x8   :  { %p295_p0 = scmp.ne.s32.totalorder %s246_s1, %s294_s18  ;;  %p299_p1 = scmp.lt.s32.totalorder %s246_s1, %s246_s1 }
   0x9   :  { %p300_p2 = scmp.lt.s32.totalorder %s294_s18, %s294_s18 }
   0xb   :  { %p301_p3 = por %p300_p2, %p299_p1 }
   0xd   :  { %p302_p4 = pnand %p301_p3, %p295_p0 }
  0x81   :  { %v20_v3 = vpop.permute.xlu0 %19 }
  0x82   :  { %v377_v4 = vmul.f32 %v267_v2, %v20_v3 }
  0x84   :  { %v32_v5 = vand.u32 2139095040, %v377_v4  ;;  %v29_v9 = vand.u32 2147483647, %v377_v4  ;;  %vm31_vm7 = vcmp.lt.s32.totalorder %v377_v4, 0 }
  0x86   :  { %v33_v6 = vshrl.u32 %v32_v5, 23  ;;  %v36_v12 = vand.u32 8388607, %v29_v9  ;;  %vm30_vm8 = vcmp.le.f32.partialorder %v29_v9, 0.7853982 }
  0x88   :  { %v268_v7 = vadd.s32 4294967169, %v33_v6  ;;  %v37_v31 = vor.u32 8388608, %v36_v12 }
  0x8a   :  { %v39_v8 = vadd.s32 1, %v268_v7  ;;  %v77_v45 = vshll.u32 %v37_v31, 8 }
  0x8c   :  { %vm40_vm0 = vcmp.gt.s32.totalorder %v39_v8, 0 }
  0x8d   :  { %v41_v10 = vsel %vm40_vm0, %v39_v8, 0  ;;  %vm121_vm0 = vweird.f32 %v377_v4 }
  0x8e   :  { %v43_v11 = vand.u32 31, %v41_v10  ;;  %v42_v14 = vshrl.u32 %v41_v10, 5 }
  0x90   :  { %v44_v13 = vsub.s32 32, %v43_v11  ;;  %v46_v16 = vshll.u32 %v343_v15, %v43_v11  ;;  %v49_v18 = vshll.u32 %v344_v17, %v43_v11  ;;  %v52_v22 = vshll.u32 %v345_v20, %v43_v11 }
  0x91   :  { %v55_v25 = vshll.u32 %v346_v23, %v43_v11  ;;  %v58_v28 = vshll.u32 %v347_v26, %v43_v11  ;;  %vm61_vm1 = vcmp.lt.s32.totalorder %v42_v14, 1  ;;  %vm64_vm2 = vcmp.lt.s32.totalorder %v42_v14, 4 }
  0x92   :  { %v47_v19 = vshrl.u32 %v344_v17, %v44_v13  ;;  %v50_v21 = vshrl.u32 %v345_v20, %v44_v13  ;;  %v53_v24 = vshrl.u32 %v346_v23, %v44_v13  ;;  %v56_v27 = vshrl.u32 %v347_v26, %v44_v13 }
  0x93   :  { %v59_v30 = vshrl.u32 %v348_v29, %v44_v13  ;;  %v45_v40 = vshrl.u32 %v343_v15, %v44_v13  ;;  %vm63_vm3 = vcmp.lt.s32.totalorder %v42_v14, 3  ;;  %vm62_vm4 = vcmp.lt.s32.totalorder %v42_v14, 2 }
  0x94   :  { %v48_v32 = vor.u32 %v47_v19, %v46_v16  ;;  %v51_v33 = vor.u32 %v50_v21, %v49_v18  ;;  %v54_v34 = vor.u32 %v53_v24, %v52_v22  ;;  %v57_v35 = vor.u32 %v56_v27, %v55_v25 }
  0x95   :  { %v60_v36 = vor.u32 %v59_v30, %v58_v28 }
  0x96   :  { %v66_v37 = vsel %vm64_vm2, %v54_v34, 2102212464  ;;  %v69_v38 = vsel %vm61_vm1, %v48_v32, %v51_v33  ;;  %v73_v39 = vsel %vm61_vm1, %v51_v33, %v54_v34  ;;  %v70_v41 = vsel %vm64_vm2, %v57_v35, 920167782 }
  0x97   :  { %v74_v42 = vsel %vm64_vm2, %v60_v36, 1326507024  ;;  %v71_v43 = vsel %vm63_vm3, %v54_v34, %v70_v41  ;;  %v65_v46 = vsel %vm61_vm1, %v45_v40, %v48_v32  ;;  %v67_v47 = vsel %vm63_vm3, %v51_v33, %v66_v37 }
  0x98   :  { %v75_v44 = vsel %vm63_vm3, %v57_v35, %v74_v42  ;;  %v72_v48 = vsel %vm62_vm4, %v69_v38, %v71_v43  ;;  %v68_v54 = vsel %vm62_vm4, %v65_v46, %v67_v47 }
  0x99   :  { %v76_v49 = vsel %vm62_vm4, %v73_v39, %v75_v44  ;;  %v386_v52 = vmul.u32.u64.low %v77_v45, %v72_v48  ;;  %v387_v53 = vmul.u32.u64.high %v77_v45, %v72_v48, %v386_v52  ;;  %v84_v56 = vmul.u32 %v77_v45, %v68_v54 }
  0x9a   :  { %v383_v50 = vmul.u32.u64.low %v77_v45, %v76_v49  ;;  %v384_v51 = vmul.u32.u64.high %v77_v45, %v76_v49, %v383_v50 }
  0x9b   :  { %v87_v55 = vadd.s32 1, %v387_v53 }
  0x9c   :  { %vm86_vm5 = vc.u32 %v384_v51, %v386_v52  ;;  %v85_v5 = vadd.s32 %v386_v52, %v384_v51 }
  0x9d   :  { %v88_v57 = vsel %vm86_vm5, %v87_v55, %v387_v53 }
  0x9e   :  { %v89_v58 = vadd.s32 %v88_v57, %v84_v56 }
  0xa0   :  { %v90_v59 = vadd.s32 536870912, %v89_v58 }
  0xa2   :  { %v91_v60 = vshrl.u32 %v90_v59, 30 }
  0xa4   :  { %v92_v61 = vshll.u32 %v91_v60, 30  ;;  %v115_v18 = vsub.s32 4, %v91_v60 }
  0xa6   :  { %v93_v62 = vsub.s32 %v89_v58, %v92_v61  ;;  %v116_v21 = vsel %vm31_vm7, %v115_v18, %v91_v60 }
  0xa7   :  { %v118_v23 = vsel %vm30_vm8, 0, %v116_v21 }
  0xa8   :  { %v95_v63 = vsub.s32 0, %v93_v62  ;;  %v122_v24 = vadd.s32 3, %v118_v23  ;;  %v228_v26 = vand.u32 3, %v118_v23 }
  0xaa   :  { %v269_v0 = vmin.u32 %v95_v63, %v93_v62  ;;  %v123_v25 = vand.u32 3, %v122_v24  ;;  %vm233_vm11 = vcmp.eq.s32.totalorder %v228_v26, 2  ;;  %vm230_vm13 = vcmp.eq.s32.totalorder %v228_v26, 0 }
  0xab   :  { %vm229_vm15 = vcmp.lt.s32.totalorder %v228_v26, 2 }
  0xac   :  { %v97_v1 = vclz %v269_v0  ;;  %vm128_vm9 = vcmp.eq.s32.totalorder %v123_v25, 2  ;;  %vm125_vm12 = vcmp.eq.s32.totalorder %v123_v25, 0  ;;  %vm124_vm14 = vcmp.lt.s32.totalorder %v123_v25, 2 }
  0xae   :  { %v270_v2 = vadd.s32 4294967294, %v97_v1 }
  0xb0   :  { %vm271_vm6 = vcmp.lt.s32.totalorder %v270_v2, 0 }
  0xb1   :  { %v100_v3 = vsel %vm271_vm6, 0, %v270_v2 }
  0xb2   :  { %v101_v6 = vsub.s32 32, %v100_v3  ;;  %v105_v7 = vsub.s32 4294967266, %v100_v3  ;;  %v102_v8 = vshll.u32 %v93_v62, %v100_v3 }
  0xb4   :  { %v103_v10 = vshrl.u32 %v85_v5, %v101_v6  ;;  %v106_v11 = vadd.s32 127, %v105_v7 }
  0xb6   :  { %v104_v12 = vor.u32 %v103_v10, %v102_v8  ;;  %v107_v13 = vshll.u32 %v106_v11, 23 }
  0xb8   :  { %v108_v14 = vor.u32 4788187, %v107_v13  ;;  %v111_v16 = vcvt.s32.f32 %v104_v12 }
  0xba   :  { %v109_v15 = vand.u32 2147483647, %v108_v14 }
  0xbc   :  { %v112_v17 = vmul.f32 %v111_v16, %v109_v15 }
  0xbe   :  { %v113_v19 = vxor.u32 2147483648, %v112_v17 }
  0xc0   :  { %v114_v20 = vsel %vm31_vm7, %v113_v19, %v112_v17 }
  0xc1   :  { %v117_v22 = vsel %vm30_vm8, %v377_v4, %v114_v20 }
  0xc2   :  { %290 = vcosq.f32 %v117_v22 }
  0xc3   :  { %292 = vsinq.f32 %v117_v22 }
  0xcc   :  { %v291_v27 = vpop.eup %290 }
  0xcd   :  { %v293_v28 = vpop.eup %292  ;;  %v129_v29 = vxor.u32 2147483648, %v291_v27 }
  0xce   :  { %v126_v30 = vxor.u32 2147483648, %v293_v28 }
  0xcf   :  { %v130_v9 = vsel %vm128_vm9, %v129_v29, %v293_v28  ;;  %v235_v31 = vsel %vm233_vm11, %v129_v29, %v293_v28 }
  0xd0   :  { %v127_v32 = vsel %vm125_vm12, %v291_v27, %v126_v30  ;;  %v232_v33 = vsel %vm230_vm13, %v291_v27, %v126_v30 }
  0xd1   :  { %v131_v34 = vsel %vm124_vm14, %v127_v32, %v130_v9  ;;  %v236_v35 = vsel %vm229_vm15, %v232_v33, %v235_v31 }
  0xd2   :  { %v132_v36 = vsel %vm121_vm0, nan, %v131_v34  ;;  %v237_v37 = vsel %vm121_vm0, nan, %v236_v35 }
  0xd3   :  { %134 = vst.msk [vmem:[#allocation2] sm:$0x3] %vm133_vm10, %v132_v36  ;;  %238 = vst.msk [vmem:[#allocation4] sm:$0x3] %vm133_vm10, %v237_v37 }
  0xd4   :  { %305 = shalt.err (!%p302_p4)
}
  0xd5   :  { %s306_s21 = scalar_lea.hbm %s426_s2, 32 }
  0xd6   :  { %p307_p5 = scmp.ne.s32.totalorder %s426_s2, %s306_s21  ;;  %p310_p6 = scmp.lt.u32.totalorder %s306_s21, %s426_s2 }
  0xd8   :  { %p312_p7 = pnand %p310_p6, %p307_p5 }
  0xda   :  { %315 = shalt.err (!%p312_p7)
}
  0xdb   :  { %248 = dma.vmem_to_hbm [thread:$0]  %s246_s1, 32, %s426_s2, [#allocation3]  }
  0xdc   :  { %s316_s28 = scalar_lea.vmem %s256_s17, 32  ;;  %p321_p9 = scmp.lt.s32.totalorder %s256_s17, %s256_s17 }
  0xdd   :  { %p317_p8 = scmp.ne.s32.totalorder %s256_s17, %s316_s28  ;;  %p322_p10 = scmp.lt.s32.totalorder %s316_s28, %s316_s28 }
  0xdf   :  { %p323_p11 = por %p322_p10, %p321_p9 }
  0xe1   :  { %p324_p12 = pnand %p323_p11, %p317_p8 }
  0xe3   :  { %327 = shalt.err (!%p324_p12)
}
  0xe4   :  { %s328_s4 = scalar_lea.hbm %s427_s3, 32 }
  0xe5   :  { %p329_p13 = scmp.ne.s32.totalorder %s427_s3, %s328_s4  ;;  %p332_p0 = scmp.lt.u32.totalorder %s328_s4, %s427_s3 }
  0xe7   :  { %p334_p1 = pnand %p332_p0, %p329_p13 }
  0xe9   :  { %337 = shalt.err (!%p334_p1)
}
  0xea   :  { %258 = dma.vmem_to_hbm [thread:$0]  %s256_s17, 32, %s427_s3, [#allocation5]  }
  0xeb   :  { %338 = dma.done.wait [#allocation3], 32  }
  0xec   :  { %339 = vsyncadd [#allocation3], 4294967264 }
  0xed   :  { %340 = dma.done.wait [#allocation5], 32  }
  0xee   :  { %341 = vsyncadd [#allocation5], 4294967264 }
  0xef   :  { %265 = vsyncpa [#allocation3], 1 }
  0xf0   :  { %266 = vsyncpa [#allocation5], 1 }

</bundles_post_ra>
